<compile_context>
chip_gen: v7x
topology: tpu7x:2x2x1
jax: 0.10.0
libtpu: 0.0.40
codegen_flags: <defaults>
</compile_context>

<pallas_src>
import functools

import jax
import jax.numpy as jnp
from jax.experimental import pallas as pl
from jax.experimental.pallas import tpu as pltpu

LANE = 128  # lane width; every layer here has <= 33 real columns -> one tile


# ----------------------------------------------------------------------------
# Pallas kernel: dueling MLP forward (5 MXU matmuls, f32 bias adds, lane-dense)
# ----------------------------------------------------------------------------
def _dueling_mlp_kernel(x_ref, w0_ref, w_ref, b_ref, va_ref):
    """x_ref : (TB, S)       bf16  state tile
       w0_ref: (S, 128)      bf16  layer-0 weight (out lanes padded to 128)
       w_ref : (N, 128, 128) bf16  remaining layers (trunk + fused heads)
       b_ref : (N+1, 1, 128) f32   all biases, full precision
       va_ref: (TB, 128)     f32   lane 0 = V, lanes 1..A = advantages, rest 0
    """
    f32 = jnp.float32
    cdt = w_ref.dtype
    n = w_ref.shape[0]

    # Layer 0: raw (TB, S) state @ (S, 128) weight.
    h = jnp.dot(x_ref[...], w0_ref[...], preferred_element_type=f32)
    h = jnp.maximum(h + b_ref[0], 0.0)

    # Hidden layers (trunk fc1/fc2 + fused head fc0): matmul + f32 bias + ReLU.
    for k in range(n - 1):
        h = jnp.dot(h.astype(cdt), w_ref[k], preferred_element_type=f32)
        h = jnp.maximum(h + b_ref[k + 1], 0.0)

    # Final fused (block-diagonal) head layer: no ReLU.
    va = jnp.dot(h.astype(cdt), w_ref[n - 1], preferred_element_type=f32)
    va_ref[...] = (va + b_ref[n]).astype(va_ref.dtype)


# ----------------------------------------------------------------------------
# Host-side parameter packing: 14 arrays -> (w0, weight slab, bias slab)
# ----------------------------------------------------------------------------
def pack_params(params, action_size, compute_dtype=jnp.bfloat16):
    # TODO(synk): packing assumes the module's default depths (3 shared layers,
    # single-hidden value/advantage heads); deeper heads would need extra
    # block-diagonal fused layers.
    (sw0, sb0, sw1, sb1, sw2, sb2,
     vw0, vb0, vw1, vb1,
     aw0, ab0, aw1, ab1) = params

    # Fuse the two head first-layers into one matmul.
    hw0 = jnp.concatenate([vw0, aw0], axis=1)
    hb0 = jnp.concatenate([jnp.reshape(vb0, (-1,)), jnp.reshape(ab0, (-1,))])

    # Fuse the two head second-layers into one block-diagonal matmul:
    # column 0 -> V, columns 1..A -> advantages.
    n_v, n_a = vw1.shape[0], aw1.shape[0]
    hw1 = jnp.zeros((n_v + n_a, 1 + action_size), jnp.float32)
    hw1 = hw1.at[:n_v, 0:1].set(vw1.astype(jnp.float32))
    hw1 = hw1.at[n_v:, 1:1 + action_size].set(aw1.astype(jnp.float32))
    hb1 = jnp.concatenate([jnp.reshape(vb1, (-1,)), jnp.reshape(ab1, (-1,))])

    layers = [(sw0, sb0), (sw1, sb1), (sw2, sb2), (hw0, hb0), (hw1, hb1)]
    for w, _ in layers:
        assert w.shape[0] <= LANE and w.shape[1] <= LANE, (
            "every layer must fit in a single 128x128 lane tile")

    def pad_w(w):
        fi, fo = w.shape
        return (jnp.zeros((LANE, LANE), jnp.float32)
                .at[:fi, :fo].set(w.astype(jnp.float32)))

    def pad_b(b):
        b = jnp.reshape(b, (-1,)).astype(jnp.float32)
        return jnp.zeros((1, LANE), jnp.float32).at[0, :b.shape[0]].set(b)

    state_size = sw0.shape[0]
    w0 = (jnp.zeros((state_size, LANE), jnp.float32)
          .at[:, :sw0.shape[1]].set(sw0.astype(jnp.float32))
          .astype(compute_dtype))
    w_slab = jnp.stack([pad_w(sw1), pad_w(sw2), pad_w(hw0), pad_w(hw1)]
                       ).astype(compute_dtype)
    b_slab = jnp.stack([pad_b(sb0), pad_b(sb1), pad_b(sb2),
                        pad_b(hb0), pad_b(hb1)])            # f32, (5, 1, 128)
    return w0, w_slab, b_slab


# ----------------------------------------------------------------------------
# Wrapper: batch-tiled pallas_call + tiny XLA epilogue for the global mean
# ----------------------------------------------------------------------------
def _round_up(n, m):
    return ((n + m - 1) // m) * m


@functools.partial(jax.jit, static_argnames=("action_size", "block_b"))
def dueling_forward(state, packed, action_size, block_b=512):
    """state: (batch, state_size) f32; packed: output of pack_params."""
    w0, w_slab, b_slab = packed
    batch, state_size = state.shape
    n_layers = w_slab.shape[0]

    # Batch tile: multiple of 8 sublanes, bounded so double-buffered tiles fit
    # comfortably in v7x's 64 MiB VMEM.
    tb = min(block_b, _round_up(batch, 8))
    b_pad = _round_up(batch, tb)

    x = state.astype(w0.dtype)
    if b_pad != batch:
        x = jnp.pad(x, ((0, b_pad - batch), (0, 0)))

    va = pl.pallas_call(
        _dueling_mlp_kernel,
        out_shape=jax.ShapeDtypeStruct((b_pad, LANE), jnp.float32),
        grid=(b_pad // tb,),
        in_specs=[
            pl.BlockSpec((tb, state_size), lambda i: (i, 0)),        # state tile
            pl.BlockSpec((state_size, LANE), lambda i: (0, 0)),      # resident
            pl.BlockSpec((n_layers, LANE, LANE), lambda i: (0, 0, 0)),
            pl.BlockSpec((n_layers + 1, 1, LANE), lambda i: (0, 0, 0)),
        ],
        out_specs=pl.BlockSpec((tb, LANE), lambda i: (i, 0)),        # lane-dense
        compiler_params=pltpu.CompilerParams(
            dimension_semantics=("parallel",)),
    )(x, w0, w_slab, b_slab)

    # Dueling combine.  PyTorch's `a.mean()` is a GLOBAL mean over batch AND
    # actions; it couples every batch row, so it lives in this tiny XLA
    # epilogue on the valid slice (padded rows are excluded from the mean).
    v = va[:batch, 0:1]
    a = va[:batch, 1:1 + action_size]
    return v + a - jnp.mean(a)


# ----------------------------------------------------------------------------
# Deterministic parameter construction (PyTorch nn.Linear-style uniform init)
# ----------------------------------------------------------------------------
def init_params(key, state_size, action_size,
                shared_hidden=(32, 32, 16), value_head=(16,), advantage_head=(16,)):
    def make_linear(k, fan_in, fan_out):
        kw, kb = jax.random.split(k)
        bound = 1.0 / jnp.sqrt(jnp.float32(fan_in))
        # stored as (in, out) so the forward computes x @ W + b
        w = jax.random.uniform(kw, (fan_in, fan_out), jnp.float32, -bound, bound)
        b = jax.random.uniform(kb, (1, fan_out), jnp.float32, -bound, bound)
        return w, b

    shared_dims = list(zip([state_size] + list(shared_hidden[:-1]), shared_hidden))
    value_dims = list(zip([shared_hidden[-1]] + list(value_head),
                          list(value_head) + [1]))
    adv_dims = list(zip([shared_hidden[-1]] + list(advantage_head),
                        list(advantage_head) + [action_size]))
    sizes = shared_dims + value_dims + adv_dims

    keys = jax.random.split(key, len(sizes))
    params = []
    for k, (fi, fo) in zip(keys, sizes):
        w, b = make_linear(k, fi, fo)
        params.extend([w, b])
    return tuple(params)


# ----------------------------------------------------------------------------
# Pure-JAX f32 reference (unfused, unpacked) for checking the kernel
# ----------------------------------------------------------------------------
def reference_forward(state, params):
    (sw0, sb0, sw1, sb1, sw2, sb2,
     vw0, vb0, vw1, vb1,
     aw0, ab0, aw1, ab1) = params
    x = state
    x = jax.nn.relu(x @ sw0 + sb0)
    x = jax.nn.relu(x @ sw1 + sb1)
    x = jax.nn.relu(x @ sw2 + sb2)
    v = jax.nn.relu(x @ vw0 + vb0)
    v = v @ vw1 + vb1
    a = jax.nn.relu(x @ aw0 + ab0)
    a = a @ aw1 + ab1
    return v + a - a.mean()


if __name__ == "__main__":
    state_size = 8
    action_size = 4

    key = jax.random.PRNGKey(0)
    k_params, k_s1, k_s2 = jax.random.split(key, 3)

    params = init_params(k_params, state_size, action_size)
    packed = pack_params(params, action_size)

    # Small inference batch (rounded up to the 8-row sublane tile internally).
    state_small = jax.random.normal(k_s1, (4, state_size), dtype=jnp.float32)
    q_small = jax.block_until_ready(
        dueling_forward(state_small, packed, action_size=action_size))
    ref_small = reference_forward(state_small, params)
    assert q_small.shape == (4, action_size)
    assert jnp.allclose(q_small, ref_small, atol=5e-2, rtol=5e-2)

    # Larger batch exercising the multi-tile parallel grid + batch padding.
    state_big = jax.random.normal(k_s2, (200, state_size), dtype=jnp.float32)
    q_big = jax.block_until_ready(
        dueling_forward(state_big, packed, action_size=action_size, block_b=64))
    ref_big = reference_forward(state_big, params)
    assert q_big.shape == (200, action_size)
    assert jnp.allclose(q_big, ref_big, atol=5e-2, rtol=5e-2)

    print("KERNEL_OK")
</pallas_src>

<mosaic_0001>
module attributes {stable_mosaic.version = 11 : i64} {
  func.func @_dueling_mlp_kernel(%arg0: i32, %arg1: memref<8x8xbf16, #tpu.memory_space<vmem>>, %arg2: memref<8x128xbf16, #tpu.memory_space<vmem>>, %arg3: memref<4x128x128xbf16, #tpu.memory_space<vmem>>, %arg4: memref<5x1x128xf32, #tpu.memory_space<vmem>>, %arg5: memref<8x128xf32, #tpu.memory_space<vmem>>) attributes {dimension_semantics = [#tpu.dimension_semantics<parallel>], iteration_bounds = array<i64: 1>, scalar_prefetch = 0 : i64, scratch_operands = 0 : i64, tpu.core_type = #tpu.core_type<tc>, window_params = [{transform_indices = @transform_0, window_bounds = array<i64: 8, 8>}, {pipeline_mode = #tpu.pipeline_mode<synchronous>, transform_indices = @transform_1, window_bounds = array<i64: 8, 128>}, {pipeline_mode = #tpu.pipeline_mode<synchronous>, transform_indices = @transform_2, window_bounds = array<i64: 4, 128, 128>}, {pipeline_mode = #tpu.pipeline_mode<synchronous>, transform_indices = @transform_3, window_bounds = array<i64: 5, 1, 128>}, {transform_indices = @transform_4, window_bounds = array<i64: 8, 128>}]} {
    %c0 = arith.constant 0 : index
    %c0_0 = arith.constant 0 : index
    %0 = vector.load %arg1[%c0, %c0_0] : memref<8x8xbf16, #tpu.memory_space<vmem>>, vector<8x8xbf16>
    %c0_1 = arith.constant 0 : index
    %c0_2 = arith.constant 0 : index
    %1 = vector.load %arg2[%c0_1, %c0_2] : memref<8x128xbf16, #tpu.memory_space<vmem>>, vector<8x128xbf16>
    %cst = arith.constant dense<0.000000e+00> : vector<8x128xf32>
    %2 = tpu.matmul %0, %1, %cst {dimension_numbers = #tpu.dot_dimension_numbers<[1], [0], [0], [1], [0, 0, 1, 1], [], []>} : vector<8x8xbf16>, vector<8x128xbf16>, vector<8x128xf32> -> vector<8x128xf32>
    %c0_3 = arith.constant 0 : index
    %c0_4 = arith.constant 0 : index
    %c0_5 = arith.constant 0 : index
    %3 = vector.load %arg4[%c0_3, %c0_4, %c0_5] : memref<5x1x128xf32, #tpu.memory_space<vmem>>, vector<1x1x128xf32>
    %4 = vector.shape_cast %3 : vector<1x1x128xf32> to vector<1x128xf32>
    %5 = vector.broadcast %4 : vector<1x128xf32> to vector<8x128xf32>
    %6 = arith.addf %2, %5 : vector<8x128xf32>
    %cst_6 = arith.constant 0.000000e+00 : f32
    %7 = vector.broadcast %cst_6 : f32 to vector<8x128xf32>
    %8 = arith.maximumf %6, %7 : vector<8x128xf32>
    %9 = arith.truncf %8 : vector<8x128xf32> to vector<8x128xbf16>
    %c0_7 = arith.constant 0 : index
    %c0_8 = arith.constant 0 : index
    %c0_9 = arith.constant 0 : index
    %10 = vector.load %arg3[%c0_7, %c0_8, %c0_9] : memref<4x128x128xbf16, #tpu.memory_space<vmem>>, vector<1x128x128xbf16>
    %11 = vector.shape_cast %10 : vector<1x128x128xbf16> to vector<128x128xbf16>
    %cst_10 = arith.constant dense<0.000000e+00> : vector<8x128xf32>
    %12 = tpu.matmul %9, %11, %cst_10 {dimension_numbers = #tpu.dot_dimension_numbers<[1], [0], [0], [1], [0, 0, 1, 1], [], []>} : vector<8x128xbf16>, vector<128x128xbf16>, vector<8x128xf32> -> vector<8x128xf32>
    %c1 = arith.constant 1 : index
    %c0_11 = arith.constant 0 : index
    %c0_12 = arith.constant 0 : index
    %13 = vector.load %arg4[%c1, %c0_11, %c0_12] : memref<5x1x128xf32, #tpu.memory_space<vmem>>, vector<1x1x128xf32>
    %14 = vector.shape_cast %13 : vector<1x1x128xf32> to vector<1x128xf32>
    %15 = vector.broadcast %14 : vector<1x128xf32> to vector<8x128xf32>
    %16 = arith.addf %12, %15 : vector<8x128xf32>
    %cst_13 = arith.constant 0.000000e+00 : f32
    %17 = vector.broadcast %cst_13 : f32 to vector<8x128xf32>
    %18 = arith.maximumf %16, %17 : vector<8x128xf32>
    %19 = arith.truncf %18 : vector<8x128xf32> to vector<8x128xbf16>
    %c1_14 = arith.constant 1 : index
    %c0_15 = arith.constant 0 : index
    %c0_16 = arith.constant 0 : index
    %20 = vector.load %arg3[%c1_14, %c0_15, %c0_16] : memref<4x128x128xbf16, #tpu.memory_space<vmem>>, vector<1x128x128xbf16>
    %21 = vector.shape_cast %20 : vector<1x128x128xbf16> to vector<128x128xbf16>
    %cst_17 = arith.constant dense<0.000000e+00> : vector<8x128xf32>
    %22 = tpu.matmul %19, %21, %cst_17 {dimension_numbers = #tpu.dot_dimension_numbers<[1], [0], [0], [1], [0, 0, 1, 1], [], []>} : vector<8x128xbf16>, vector<128x128xbf16>, vector<8x128xf32> -> vector<8x128xf32>
    %c2 = arith.constant 2 : index
    %c0_18 = arith.constant 0 : index
    %c0_19 = arith.constant 0 : index
    %23 = vector.load %arg4[%c2, %c0_18, %c0_19] : memref<5x1x128xf32, #tpu.memory_space<vmem>>, vector<1x1x128xf32>
    %24 = vector.shape_cast %23 : vector<1x1x128xf32> to vector<1x128xf32>
    %25 = vector.broadcast %24 : vector<1x128xf32> to vector<8x128xf32>
    %26 = arith.addf %22, %25 : vector<8x128xf32>
    %cst_20 = arith.constant 0.000000e+00 : f32
    %27 = vector.broadcast %cst_20 : f32 to vector<8x128xf32>
    %28 = arith.maximumf %26, %27 : vector<8x128xf32>
    %29 = arith.truncf %28 : vector<8x128xf32> to vector<8x128xbf16>
    %c2_21 = arith.constant 2 : index
    %c0_22 = arith.constant 0 : index
    %c0_23 = arith.constant 0 : index
    %30 = vector.load %arg3[%c2_21, %c0_22, %c0_23] : memref<4x128x128xbf16, #tpu.memory_space<vmem>>, vector<1x128x128xbf16>
    %31 = vector.shape_cast %30 : vector<1x128x128xbf16> to vector<128x128xbf16>
    %cst_24 = arith.constant dense<0.000000e+00> : vector<8x128xf32>
    %32 = tpu.matmul %29, %31, %cst_24 {dimension_numbers = #tpu.dot_dimension_numbers<[1], [0], [0], [1], [0, 0, 1, 1], [], []>} : vector<8x128xbf16>, vector<128x128xbf16>, vector<8x128xf32> -> vector<8x128xf32>
    %c3 = arith.constant 3 : index
    %c0_25 = arith.constant 0 : index
    %c0_26 = arith.constant 0 : index
    %33 = vector.load %arg4[%c3, %c0_25, %c0_26] : memref<5x1x128xf32, #tpu.memory_space<vmem>>, vector<1x1x128xf32>
    %34 = vector.shape_cast %33 : vector<1x1x128xf32> to vector<1x128xf32>
    %35 = vector.broadcast %34 : vector<1x128xf32> to vector<8x128xf32>
    %36 = arith.addf %32, %35 : vector<8x128xf32>
    %cst_27 = arith.constant 0.000000e+00 : f32
    %37 = vector.broadcast %cst_27 : f32 to vector<8x128xf32>
    %38 = arith.maximumf %36, %37 : vector<8x128xf32>
    %39 = arith.truncf %38 : vector<8x128xf32> to vector<8x128xbf16>
    %c3_28 = arith.constant 3 : index
    %c0_29 = arith.constant 0 : index
    %c0_30 = arith.constant 0 : index
    %40 = vector.load %arg3[%c3_28, %c0_29, %c0_30] : memref<4x128x128xbf16, #tpu.memory_space<vmem>>, vector<1x128x128xbf16>
    %41 = vector.shape_cast %40 : vector<1x128x128xbf16> to vector<128x128xbf16>
    %cst_31 = arith.constant dense<0.000000e+00> : vector<8x128xf32>
    %42 = tpu.matmul %39, %41, %cst_31 {dimension_numbers = #tpu.dot_dimension_numbers<[1], [0], [0], [1], [0, 0, 1, 1], [], []>} : vector<8x128xbf16>, vector<128x128xbf16>, vector<8x128xf32> -> vector<8x128xf32>
    %c4 = arith.constant 4 : index
    %c0_32 = arith.constant 0 : index
    %c0_33 = arith.constant 0 : index
    %43 = vector.load %arg4[%c4, %c0_32, %c0_33] : memref<5x1x128xf32, #tpu.memory_space<vmem>>, vector<1x1x128xf32>
    %44 = vector.shape_cast %43 : vector<1x1x128xf32> to vector<1x128xf32>
    %45 = vector.broadcast %44 : vector<1x128xf32> to vector<8x128xf32>
    %46 = arith.addf %42, %45 : vector<8x128xf32>
    %c0_34 = arith.constant 0 : index
    %c0_35 = arith.constant 0 : index
    %47 = vector.load %arg5[%c0_34, %c0_35] : memref<8x128xf32, #tpu.memory_space<vmem>>, vector<8x128xf32>
    tpu.vector_store %arg5[%c0_34, %c0_35], %46 {strides = array<i32>} : memref<8x128xf32, #tpu.memory_space<vmem>>, vector<8x128xf32>,
    return
  }
  func.func @transform_0(%arg0: i32) -> (i32, i32) {
    %c0_i32 = arith.constant 0 : i32
    %c0_i32_0 = arith.constant 0 : i32
    return %arg0, %c0_i32 : i32, i32
  }
  func.func @transform_1(%arg0: i32) -> (i32, i32) {
    %c0_i32 = arith.constant 0 : i32
    %c0_i32_0 = arith.constant 0 : i32
    %c0_i32_1 = arith.constant 0 : i32
    return %c0_i32, %c0_i32_0 : i32, i32
  }
  func.func @transform_2(%arg0: i32) -> (i32, i32, i32) {
    %c0_i32 = arith.constant 0 : i32
    %c0_i32_0 = arith.constant 0 : i32
    %c0_i32_1 = arith.constant 0 : i32
    %c0_i32_2 = arith.constant 0 : i32
    return %c0_i32, %c0_i32_0, %c0_i32_1 : i32, i32, i32
  }
  func.func @transform_3(%arg0: i32) -> (i32, i32, i32) {
    %c0_i32 = arith.constant 0 : i32
    %c0_i32_0 = arith.constant 0 : i32
    %c0_i32_1 = arith.constant 0 : i32
    %c0_i32_2 = arith.constant 0 : i32
    return %c0_i32, %c0_i32_0, %c0_i32_1 : i32, i32, i32
  }
  func.func @transform_4(%arg0: i32) -> (i32, i32) {
    %c0_i32 = arith.constant 0 : i32
    %c0_i32_0 = arith.constant 0 : i32
    return %arg0, %c0_i32 : i32, i32
  }
}

</mosaic_0001>

<bundles_post_ra>
// kernel: dueling_forward.1
= control target key start
LH: loop header
LB: loop body
LE: loop exit
PB: predicated region body
PF: predicated region fallthrough
CT: control target
= control target key end

     0   :  { %9 = vsyncpa [#allocation3], 0  ;;  %s781_s15 = smov [#allocation2]   ;;  %s890_s0 = inlined_call_operand.vmem [shape: bf16[8,8], index: 0, kind: input, shape index: {}]   ;;  %s891_s1 = inlined_call_operand.vmem [shape: bf16[8,128], index: 1, kind: input, shape index: {}]   ;;  %s892_s2 = inlined_call_operand.hbm [shape: bf16[4,128,128], index: 2, kind: input, shape index: {}]   ;;  %s893_s3 = inlined_call_operand.vmem [shape: f32[5,1,128], index: 3, kind: input, shape index: {}]   ;;  %s894_s4 = inlined_call_operand.vmem [shape: f32[8,128], index: 4, kind: output, shape index: {}]  }
   0x1   :  { %s19_s16 = sshll.u32 %s781_s15, 4  ;;  %s757_s19 = scalar_lea.hbm %s892_s2, 4096  ;;  %s20_s16 = int_to_ptr.vmem [resolvable:$true] %s19_s16 }
   0x2   :  { %p758_p0 = scmp.ne.s32.totalorder %s892_s2, %s757_s19  ;;  %p761_p1 = scmp.lt.u32.totalorder %s757_s19, %s892_s2 }
   0x4   :  { %p763_p2 = pnand %p761_p1, %p758_p0 }
   0x6   :  { %766 = shalt.err (!%p763_p2)
}
   0x7   :  { %s767_s24 = scalar_lea.vmem %s20_s16, 4096  ;;  %p772_p4 = scmp.lt.s32.totalorder %s20_s16, %s20_s16 }
   0x8   :  { %p768_p3 = scmp.ne.s32.totalorder %s20_s16, %s767_s24  ;;  %p773_p5 = scmp.lt.s32.totalorder %s767_s24, %s767_s24 }
   0xa   :  { %p774_p6 = por %p773_p5, %p772_p4 }
   0xc   :  { %p775_p7 = pnand %p774_p6, %p768_p3 }
   0xe   :  { %778 = shalt.err (!%p775_p7)
}
   0xf   :  { %s782_s25 = smov 64   ;;  %s783_s26 = smov 4  }
  0x10   :  { %25 = dma.hbm_to_vmem [thread:$0]  %s892_s2, 4096, %s20_s16, [#allocation3], %s782_s25, %s782_s25, %s783_s26  }
  0x11   :  { %779 = dma.done.wait [#allocation3], 4096  }
  0x12   :  { %780 = vsyncadd [#allocation3], 4294963200  ;;  %v784_v0 = vmov 0.0   ;;  %vm785_vm0 = vmmov 0   ;;  %vm45_vm1 = vcmask 1043456   ;;  %vm41_vm2 = vcmask 64512  }
  0x13   :  { %634 = vmatprep.subr.bf16.mxu0 %v784_v0  ;;  %636 = vmatprep.mubr.msk.bf16.mxu0 %vm785_vm0, %v784_v0  ;;  %v33_v1 = vld [vmem:[%s891_s1] sm:$0xf]  ;;  %v726_v5 = vld [vmem:[#allocation2 + $0x8] sm:$0xff]   ;;  %v727_v6 = vld [vmem:[#allocation2 + $0x10] sm:$0xff]  }
  0x14   :  { %640 = vmatprep.subr.bf16.mxu1 %v784_v0  ;;  %656 = vmatprep.mubr.msk.bf16.mxu1 %vm785_vm0, %v784_v0  ;;  %v47_v2 = vsel %vm45_vm1, %v33_v1, 0  ;;  %v725_v3 = vld [vmem:[#allocation2] sm:$0xff]   ;;  %v728_v7 = vld [vmem:[#allocation2 + $0x18] sm:$0xff]   ;;  %v730_v9 = vld [vmem:[#allocation2 + $0x28] sm:$0xff]  }
  0x15   :  { %635 = vmatpush3.bf16.msra.mxu0 %v47_v2  ;;  %v32_v4 = vld [vmem:[%s890_s0] sm:$0xf]  ;;  %641 = vmatpush3.bf16.msra.mxu1 %v725_v3  ;;  %v731_v10 = vld [vmem:[#allocation2 + $0x30] sm:$0xff]   ;;  %v732_v11 = vld [vmem:[#allocation2 + $0x38] sm:$0xff]  }
  0x16   :  { %660 = vmatprep.subr.bf16.mxu0 %v784_v0  ;;  %642 = vmatprep.subr.bf16.mxu1 %v784_v0  ;;  %v729_v8 = vld [vmem:[#allocation2 + $0x20] sm:$0xff]   ;;  %v734_v13 = vld [vmem:[#allocation2 + $0x48] sm:$0xff]   ;;  %v735_v14 = vld [vmem:[#allocation2 + $0x50] sm:$0xff]  }
  0x17   :  { %v733_v12 = vld [vmem:[#allocation2 + $0x40] sm:$0xff]   ;;  %v736_v15 = vld [vmem:[#allocation2 + $0x58] sm:$0xff]   ;;  %v738_v17 = vld [vmem:[#allocation2 + $0x68] sm:$0xff]  }
  0x18   :  { %637 = vmatmul.mubr.msk.bf16.vlgmr.msra.gmra.mrb[0].mxu0 %vm41_vm2, %v32_v4  ;;  %v737_v16 = vld [vmem:[#allocation2 + $0x60] sm:$0xff]   ;;  %v739_v26 = vld [vmem:[#allocation2 + $0x70] sm:$0xff]   ;;  %v740_v27 = vld [vmem:[#allocation2 + $0x78] sm:$0xff]  }
  0x19   :  { %676 = vmatprep.mubr.msk.bf16.mxu0 %vm785_vm0, %v784_v0  ;;  %643 = vmatpush3.bf16.msra.mxu1 %v726_v5  ;;  %v554_v18 = vld [vmem:[%s893_s3] ss:$0 sm:$0xff]  ;;  %v742_v29 = vld [vmem:[#allocation2 + $0x88] sm:$0xff]   ;;  %v743_v30 = vld [vmem:[#allocation2 + $0x90] sm:$0xff]  }
  0x1a   :  { %644 = vmatprep.subr.bf16.mxu1 %v784_v0  ;;  %661 = vmatpush3.bf16.msra.mxu0 %v733_v12  ;;  %v741_v28 = vld [vmem:[#allocation2 + $0x80] sm:$0xff]   ;;  %v744_v31 = vld [vmem:[#allocation2 + $0x98] sm:$0xff]   ;;  %v746_v33 = vld [vmem:[#allocation2 + $0xa8] sm:$0xff]  }
  0x1b   :  { %662 = vmatprep.subr.bf16.mxu0 %v784_v0  ;;  %v745_v32 = vld [vmem:[#allocation2 + $0xa0] sm:$0xff]   ;;  %v747_v42 = vld [vmem:[#allocation2 + $0xb0] sm:$0xff]   ;;  %v748_v43 = vld [vmem:[#allocation2 + $0xb8] sm:$0xff]  }
  0x1c   :  { %v557_v34 = vld [vmem:[%s893_s3 + $0x1] ss:$0 sm:$0xff]  ;;  %v750_v45 = vld [vmem:[#allocation2 + $0xc8] sm:$0xff]   ;;  %v751_v46 = vld [vmem:[#allocation2 + $0xd0] sm:$0xff]  }
  0x1d   :  { %645 = vmatpush3.bf16.msra.mxu1 %v727_v6  ;;  %v749_v44 = vld [vmem:[#allocation2 + $0xc0] sm:$0xff]   ;;  %v752_v47 = vld [vmem:[#allocation2 + $0xd8] sm:$0xff]   ;;  %v754_v49 = vld [vmem:[#allocation2 + $0xe8] sm:$0xff]  }
  0x1e   :  { %646 = vmatprep.subr.bf16.mxu1 %v784_v0  ;;  %663 = vmatpush3.bf16.msra.mxu0 %v734_v13  ;;  %v753_v48 = vld [vmem:[#allocation2 + $0xe0] sm:$0xff]   ;;  %v755_v58 = vld [vmem:[#allocation2 + $0xf0] sm:$0xff]   ;;  %v756_v59 = vld [vmem:[#allocation2 + $0xf8] sm:$0xff]  }
  0x1f   :  { %664 = vmatprep.subr.bf16.mxu0 %v784_v0  ;;  %v567_v50 = vld [vmem:[%s893_s3 + $0x2] ss:$0 sm:$0xff]  ;;  %v577_v60 = vld [vmem:[%s893_s3 + $0x3] ss:$0 sm:$0xff]  ;;  %v587_v5 = vld [vmem:[%s893_s3 + $0x4] ss:$0 sm:$0xff] }
  0x21   :  { %647 = vmatpush3.bf16.msra.mxu1 %v728_v7 }
  0x22   :  { %648 = vmatprep.subr.bf16.mxu1 %v784_v0  ;;  %665 = vmatpush3.bf16.msra.mxu0 %v735_v14 }
  0x23   :  { %666 = vmatprep.subr.bf16.mxu0 %v784_v0 }
  0x25   :  { %649 = vmatpush3.bf16.msra.mxu1 %v729_v8 }
  0x26   :  { %650 = vmatprep.subr.bf16.mxu1 %v784_v0  ;;  %667 = vmatpush3.bf16.msra.mxu0 %v736_v15 }
  0x27   :  { %668 = vmatprep.subr.bf16.mxu0 %v784_v0 }
  0x29   :  { %651 = vmatpush3.bf16.msra.mxu1 %v730_v9 }
  0x2a   :  { %652 = vmatprep.subr.bf16.mxu1 %v784_v0  ;;  %669 = vmatpush3.bf16.msra.mxu0 %v737_v16 }
  0x2b   :  { %670 = vmatprep.subr.bf16.mxu0 %v784_v0 }
  0x2d   :  { %653 = vmatpush3.bf16.msra.mxu1 %v731_v10 }
  0x2e   :  { %654 = vmatprep.subr.bf16.mxu1 %v784_v0  ;;  %671 = vmatpush3.bf16.msra.mxu0 %v738_v17 }
  0x2f   :  { %672 = vmatprep.subr.bf16.mxu0 %v784_v0 }
  0x31   :  { %655 = vmatpush3.bf16.msra.mxu1 %v732_v11 }
  0x32   :  { %680 = vmatprep.subr.bf16.mxu1 %v784_v0  ;;  %673 = vmatpush3.bf16.msra.mxu0 %v739_v26 }
  0x33   :  { %674 = vmatprep.subr.bf16.mxu0 %v784_v0 }
  0x36   :  { %675 = vmatpush3.bf16.msra.mxu0 %v740_v27 }
  0x37   :  { %700 = vmatprep.subr.bf16.mxu0 %v784_v0 }
  0xeb   :  { %v83_v19 = vpop.f32.mrb[0].mxu0 }
  0xec   :  { %v84_v20 = vadd.f32 %v554_v18, %v83_v19  ;;  %v638_v21 = vpop.f32.mrb[1].mxu0 }
  0xed   :  { %v86_v22 = vpop.f32.mrb[2].mxu0 }
  0xee   :  { %v89_v23 = vmax.f32 %v84_v20, 0.0  ;;  %v639_v24 = vpop.f32.mrb[3].mxu0 }
  0xf0   :  { %v90_v25 = vpack.c.bf16 %v89_v23, %v89_v23 }
  0xf2   :  { %657 = vmatmul.mubr.bf16.vlgmr.msra.gmra.mrb[0].mxu1 %v90_v25 }
  0xf3   :  { %696 = vmatprep.mubr.msk.bf16.mxu1 %vm785_vm0, %v784_v0  ;;  %681 = vmatpush3.bf16.msra.mxu1 %v741_v28 }
  0xf4   :  { %682 = vmatprep.subr.bf16.mxu1 %v784_v0 }
  0xf7   :  { %683 = vmatpush3.bf16.msra.mxu1 %v742_v29 }
  0xf8   :  { %684 = vmatprep.subr.bf16.mxu1 %v784_v0 }
  0xfb   :  { %685 = vmatpush3.bf16.msra.mxu1 %v743_v30 }
  0xfc   :  { %686 = vmatprep.subr.bf16.mxu1 %v784_v0 }
  0xff   :  { %687 = vmatpush3.bf16.msra.mxu1 %v744_v31 }
 0x100   :  { %688 = vmatprep.subr.bf16.mxu1 %v784_v0 }
 0x103   :  { %689 = vmatpush3.bf16.msra.mxu1 %v745_v32 }
 0x104   :  { %690 = vmatprep.subr.bf16.mxu1 %v784_v0 }
 0x107   :  { %691 = vmatpush3.bf16.msra.mxu1 %v746_v33 }
 0x108   :  { %692 = vmatprep.subr.bf16.mxu1 %v784_v0 }
 0x10b   :  { %693 = vmatpush3.bf16.msra.mxu1 %v747_v42 }
 0x10c   :  { %694 = vmatprep.subr.bf16.mxu1 %v784_v0 }
 0x10f   :  { %695 = vmatpush3.bf16.msra.mxu1 %v748_v43 }
 0x1c5   :  { %v197_v35 = vpop.f32.mrb[0].mxu1 }
 0x1c6   :  { %v198_v36 = vadd.f32 %v557_v34, %v197_v35  ;;  %v658_v37 = vpop.f32.mrb[1].mxu1 }
 0x1c7   :  { %v200_v38 = vpop.f32.mrb[2].mxu1 }
 0x1c8   :  { %v203_v39 = vmax.f32 %v198_v36, 0.0  ;;  %v659_v40 = vpop.f32.mrb[3].mxu1 }
 0x1ca   :  { %v204_v41 = vpack.c.bf16 %v203_v39, %v203_v39 }
 0x1cc   :  { %677 = vmatmul.mubr.bf16.vlgmr.msra.gmra.mrb[4].mxu0 %v204_v41 }
 0x1cd   :  { %716 = vmatprep.mubr.msk.bf16.mxu0 %vm785_vm0, %v784_v0  ;;  %701 = vmatpush3.bf16.msra.mxu0 %v749_v44 }
 0x1ce   :  { %702 = vmatprep.subr.bf16.mxu0 %v784_v0 }
 0x1d1   :  { %703 = vmatpush3.bf16.msra.mxu0 %v750_v45 }
 0x1d2   :  { %704 = vmatprep.subr.bf16.mxu0 %v784_v0 }
 0x1d5   :  { %705 = vmatpush3.bf16.msra.mxu0 %v751_v46 }
 0x1d6   :  { %706 = vmatprep.subr.bf16.mxu0 %v784_v0 }
 0x1d9   :  { %707 = vmatpush3.bf16.msra.mxu0 %v752_v47 }
 0x1da   :  { %708 = vmatprep.subr.bf16.mxu0 %v784_v0 }
 0x1dd   :  { %709 = vmatpush3.bf16.msra.mxu0 %v753_v48 }
 0x1de   :  { %710 = vmatprep.subr.bf16.mxu0 %v784_v0 }
 0x1e1   :  { %711 = vmatpush3.bf16.msra.mxu0 %v754_v49 }
 0x1e2   :  { %712 = vmatprep.subr.bf16.mxu0 %v784_v0 }
 0x1e5   :  { %713 = vmatpush3.bf16.msra.mxu0 %v755_v58 }
 0x1e6   :  { %714 = vmatprep.subr.bf16.mxu0 %v784_v0 }
 0x1e9   :  { %715 = vmatpush3.bf16.msra.mxu0 %v756_v59 }
 0x29f   :  { %v312_v51 = vpop.f32.mrb[4].mxu0 }
 0x2a0   :  { %v313_v52 = vadd.f32 %v567_v50, %v312_v51  ;;  %v678_v53 = vpop.f32.mrb[5].mxu0 }
 0x2a1   :  { %v315_v54 = vpop.f32.mrb[6].mxu0 }
 0x2a2   :  { %v318_v55 = vmax.f32 %v313_v52, 0.0  ;;  %v679_v56 = vpop.f32.mrb[7].mxu0 }
 0x2a4   :  { %v319_v57 = vpack.c.bf16 %v318_v55, %v318_v55 }
 0x2a6   :  { %697 = vmatmul.mubr.bf16.vlgmr.msra.gmra.mrb[4].mxu1 %v319_v57 }
 0x379   :  { %v427_v61 = vpop.f32.mrb[4].mxu1 }
 0x37a   :  { %v428_v62 = vadd.f32 %v577_v60, %v427_v61  ;;  %v698_v63 = vpop.f32.mrb[5].mxu1 }
 0x37b   :  { %v430_v1 = vpop.f32.mrb[6].mxu1 }
 0x37c   :  { %v433_v2 = vmax.f32 %v428_v62, 0.0  ;;  %v699_v3 = vpop.f32.mrb[7].mxu1 }
 0x37e   :  { %v434_v4 = vpack.c.bf16 %v433_v2, %v433_v2 }
 0x380   :  { %717 = vmatmul.mubr.bf16.vlgmr.msra.gmra.mrb[8].mxu0 %v434_v4 }
 0x453   :  { %v542_v6 = vpop.f32.mrb[8].mxu0 }
 0x454   :  { %v543_v0 = vadd.f32 %v587_v5, %v542_v6  ;;  %v718_v7 = vpop.f32.mrb[9].mxu0 }
 0x455   :  { %v545_v8 = vpop.f32.mrb[10].mxu0 }
 0x456   :  { %548 = vst [vmem:[%s894_s4] sm:$0xff] %v543_v0  ;;  %v719_v9 = vpop.f32.mrb[11].mxu0 }
 0x457   :  { %553 = vsyncpa [#allocation3], 1 }

</bundles_post_ra>
